<compile_context>
chip_gen: v7x
topology: tpu7x:2x2x1
jax: 0.10.0
libtpu: 0.0.40
codegen_flags: <defaults>
</compile_context>

<pallas_src>
import jax
import jax.numpy as jnp
from jax import lax
from jax.experimental import pallas as pl
from jax.experimental.pallas import tpu as pltpu


def _round_up(a, m):
    return -(-a // m) * m


def _vmem_capacity_bytes():
    try:
        info = pltpu.get_tpu_info()
        cap = getattr(info, "vmem_capacity_bytes", None)
        if cap:
            return int(cap)
    except Exception:
        pass
    return 64 << 20  # conservative default (v7x per-TensorCore VMEM)


def _footprint_bytes(Bb, C_in, C_out, K, TL, HW, itemsize):
    """Rough per-step VMEM footprint: double-buffered I/O tiles + params + scratch."""
    su = lambda c: _round_up(c, 8)                       # sublane padding
    x_tile = Bb * su(C_in) * TL * itemsize
    h_tile = Bb * su(C_in) * HW * itemsize
    o_tile = Bb * su(C_out) * TL * itemsize
    w_tile = su(C_out) * _round_up(K * C_in, 128) * itemsize
    b_tile = su(C_out) * 128 * 4
    pipelined = 2 * (x_tile + h_tile + o_tile) + 2 * (w_tile + b_tile)
    # f32 in-kernel intermediates (ext / im2col slab / accumulator) per batch row.
    scratch = Bb * (su(C_in) * (TL + HW) + su(K * C_in) * TL + su(C_out) * TL) * 4
    return pipelined + scratch


def _select_tiling(B, C_in, C_out, K, pad, L_pad, itemsize,
                   max_time_tile, max_batch_block, vmem_budget):
    """Pick (time tile TL, halo width HW, batch block Bb) fitting the VMEM budget."""
    start = max(128, (min(L_pad, max(128, max_time_tile)) // 128) * 128)
    tl_cands = [c for c in range(start, 127, -128) if L_pad % c == 0]
    tl_ok = [c for c in tl_cands if c >= pad]
    if not tl_ok:
        # Receptive field reaches further back than any affordable tile: fall back
        # to a single time tile so only the zero history is ever needed.
        tl_ok = [L_pad]
    bb_cands = [d for d in (8, 4, 2, 1)
                if d <= max(1, max_batch_block) and B % d == 0] or [1]

    def halo_width(tl):
        hw = _round_up(max(pad, 1), 128)
        if hw > tl or tl % hw != 0:
            hw = tl
        return hw

    for tl in tl_ok:                       # biggest time tile first (lane-contiguous DMA)
        hw = halo_width(tl)
        for bb in bb_cands:                # then biggest batch block that still fits
            if _footprint_bytes(bb, C_in, C_out, K, tl, hw, itemsize) <= vmem_budget:
                return tl, hw, bb
    tl = tl_ok[-1]
    return tl, halo_width(tl), bb_cands[-1]


def _make_kernel(Bb, C_in, C_out, K, dilation, pad, TL, HW):
    use_mxu = (K * C_in) >= 16   # the 256-wide MXU beats a VPU FMA chain well below full depth

    def kernel(xc_ref, xh_ref, w_ref, b_ref, o_ref):
        # xc_ref: (Bb, C_in, TL)   current time tile   (time on lanes)
        # xh_ref: (Bb, C_in, HW)   last HW columns of the previous tile (causal halo)
        # w_ref : (C_out, K*C_in)  flattened weights, w[o, j*C_in + i] = W[o, i, j]
        # b_ref : (C_out, 1)       bias (f32)
        # o_ref : (Bb, C_out, TL)
        t = pl.program_id(1)
        w = w_ref[...]                                    # native dtype (MXU path)
        bias = b_ref[...].astype(jnp.float32)             # (C_out, 1)

        for b in range(Bb):
            cur = xc_ref[b]                               # (C_in, TL)
            if pad > 0:
                halo = xh_ref[b]                          # (C_in, HW)
                # Causal zero-history at the very first time tile.
                halo = jnp.where(t > 0, halo, jnp.zeros_like(halo))
                if HW < pad:                              # single-tile fallback only
                    halo = jnp.concatenate(
                        [jnp.zeros((C_in, pad - HW), halo.dtype), halo], axis=1)
                    base = pad
                else:
                    base = HW
                ext = jnp.concatenate([halo, cur], axis=1)    # (C_in, base + TL)
            else:
                ext, base = cur, 0

            def win(j):
                s = (K - 1 - j) * dilation
                return ext[:, base - s: base - s + TL]    # static slice

            if use_mxu:
                # Fused im2col: one (C_out, K*C_in) @ (K*C_in, TL) matmul in the
                # native input dtype with an f32 accumulator on the MXU.
                slab = jnp.concatenate([win(j) for j in range(K)], axis=0)
                acc = jnp.dot(w, slab, preferred_element_type=jnp.float32)
            else:
                # Tiny contraction: VPU broadcast-FMAs on (C_out, TL) tiles.
                w32 = w.astype(jnp.float32)
                acc = jnp.zeros((C_out, TL), jnp.float32)
                for j in range(K):
                    wj = win(j).astype(jnp.float32)
                    for i in range(C_in):
                        idx = j * C_in + i
                        acc = acc + w32[:, idx:idx + 1] * wj[i:i + 1, :]

            # Bias folded into the epilogue store.
            o_ref[b] = (acc + bias).astype(o_ref.dtype)

    return kernel


def causal_conv1d(x, weight, bias, dilation=1, *, max_time_tile=4096, max_batch_block=8):
    """x: (B, C_in, L); weight: (C_out, C_in, K); bias: (C_out,) -> (B, C_out, L)."""
    B, C_in, L = x.shape
    C_out, C_in_w, K = weight.shape
    assert C_in_w == C_in
    pad = (K - 1) * dilation

    # Lane-dense time: right-pad L to a multiple of 128 (the conv is causal, so the
    # valid outputs are unchanged; the padded tail is sliced off at the end).
    L_pad = _round_up(max(L, 128), 128)
    x_p = x if L_pad == L else jnp.pad(x, ((0, 0), (0, 0), (0, L_pad - L)))

    itemsize = jnp.dtype(x.dtype).itemsize
    vmem_cap = _vmem_capacity_bytes()
    TL, HW, Bb = _select_tiling(B, C_in, C_out, K, pad, L_pad, itemsize,
                                max_time_tile, max_batch_block, vmem_cap // 2)
    n_b, n_t = B // Bb, L_pad // TL
    halo_blocks_per_tile = TL // HW
    # One previous HW-wide block must cover the full receptive field (or be a
    # single-tile run where only zero history is needed).
    assert HW >= pad or n_t == 1, "causal halo must cover the full receptive field"

    # Tiny one-off parameter re-layouts; x stays untouched in NCL (time on lanes).
    w2 = jnp.transpose(weight, (0, 2, 1)).reshape(C_out, K * C_in).astype(x.dtype)
    b2 = bias.reshape(C_out, 1).astype(jnp.float32)

    kernel = _make_kernel(Bb, C_in, C_out, K, dilation, pad, TL, HW)
    footprint = _footprint_bytes(Bb, C_in, C_out, K, TL, HW, itemsize)
    vmem_limit = int(max(32 << 20, min(2 * footprint + (4 << 20), (vmem_cap * 3) // 4)))

    out = pl.pallas_call(
        kernel,
        out_shape=jax.ShapeDtypeStruct((B, C_out, L_pad), x.dtype),
        grid=(n_b, n_t),
        in_specs=[
            # Current time tile.
            pl.BlockSpec((Bb, C_in, TL), lambda b, t: (b, 0, t)),
            # Causal halo: the last HW columns before the current tile (a narrow
            # HW-wide block of x, not a whole tile).  Clamped at t == 0, where it
            # is zeroed inside the kernel to preserve the causal zero-history.
            pl.BlockSpec((Bb, C_in, HW),
                         lambda b, t: (b, 0, jnp.maximum(t * halo_blocks_per_tile - 1, 0))),
            # Flattened weights / bias: grid-constant, stay VMEM-resident.
            pl.BlockSpec((C_out, K * C_in), lambda b, t: (0, 0)),
            pl.BlockSpec((C_out, 1), lambda b, t: (0, 0)),
        ],
        out_specs=pl.BlockSpec((Bb, C_out, TL), lambda b, t: (b, 0, t)),
        compiler_params=pltpu.CompilerParams(
            dimension_semantics=("parallel", "parallel"),
            vmem_limit_bytes=vmem_limit),
    )(x_p, x_p, w2, b2)

    return out if L_pad == L else out[:, :, :L]


def causal_conv1d_ref(x, weight, bias, dilation=1):
    """Plain-JAX reference reproducing the PyTorch module exactly (f32)."""
    K = weight.shape[-1]
    pad = (K - 1) * dilation
    y = lax.conv_general_dilated(
        x, weight,
        window_strides=(1,),
        padding=[(pad, 0)],                 # causal: left pad only (== pad both + slice)
        rhs_dilation=(dilation,),
        dimension_numbers=("NCH", "OIH", "NCH"),
        precision=lax.Precision.HIGHEST,
    )
    return y + bias[None, :, None]


if __name__ == "__main__":
    def run_case(B, C_in, C_out, K, dilation, L, key, dtype=jnp.float32, tol=1e-5, **kw):
        kx, kwt, kb = jax.random.split(key, 3)
        x = jax.random.normal(kx, (B, C_in, L), dtype=jnp.float32).astype(dtype)
        bound = 1.0 / (C_in * K) ** 0.5
        weight = jax.random.uniform(kwt, (C_out, C_in, K),
                                    minval=-bound, maxval=bound).astype(dtype)
        bias = jax.random.uniform(kb, (C_out,),
                                  minval=-bound, maxval=bound).astype(dtype)
        y = jax.block_until_ready(
            causal_conv1d(x, weight, bias, dilation=dilation, **kw))
        y_ref = causal_conv1d_ref(x.astype(jnp.float32), weight.astype(jnp.float32),
                                  bias.astype(jnp.float32), dilation=dilation)
        assert y.shape == (B, C_out, L)
        assert y.dtype == x.dtype
        assert jnp.allclose(y.astype(jnp.float32), y_ref, atol=tol, rtol=tol), \
            "mismatch vs reference"

    key = jax.random.PRNGKey(0)
    k1, k2, k3 = jax.random.split(key, 3)
    # Module-default-like config (K*C_in=12 -> VPU path; single time tile after 128-pad).
    run_case(B=2, C_in=4, C_out=8, K=3, dilation=2, L=16, key=k1)
    # Multi-time-tile config (tile capped to 128): exercises the narrow causal halo
    # carried from the previous tile and the batch-blocked grid.
    run_case(B=2, C_in=4, C_out=8, K=3, dilation=2, L=384, key=k2, max_time_tile=128)
    # Wider channels in bf16 (K*C_in=32): fused im2col MXU path with native-dtype
    # operands and an f32 accumulator.
    run_case(B=2, C_in=16, C_out=16, K=2, dilation=1, L=256, key=k3,
             dtype=jnp.bfloat16, tol=5e-2)

    print("KERNEL_OK")
</pallas_src>

<mosaic_0001>
module attributes {stable_mosaic.version = 11 : i64} {
  func.func @kernel(%arg0: i32, %arg1: i32, %arg2: memref<2x4x128xf32, #tpu.memory_space<vmem>>, %arg3: memref<2x4x128xf32, #tpu.memory_space<vmem>>, %arg4: memref<8x12xf32, #tpu.memory_space<vmem>>, %arg5: memref<8x1xf32, #tpu.memory_space<vmem>>, %arg6: memref<2x8x128xf32, #tpu.memory_space<vmem>>) attributes {dimension_semantics = [#tpu.dimension_semantics<parallel>, #tpu.dimension_semantics<parallel>], iteration_bounds = array<i64: 1, 1>, scalar_prefetch = 0 : i64, scratch_operands = 0 : i64, tpu.core_type = #tpu.core_type<tc>, window_params = [{transform_indices = @transform_0, window_bounds = array<i64: 2, 4, 128>}, {transform_indices = @transform_1, window_bounds = array<i64: 2, 4, 128>}, {pipeline_mode = #tpu.pipeline_mode<synchronous>, transform_indices = @transform_2, window_bounds = array<i64: 8, 12>}, {pipeline_mode = #tpu.pipeline_mode<synchronous>, transform_indices = @transform_3, window_bounds = array<i64: 8, 1>}, {transform_indices = @transform_4, window_bounds = array<i64: 2, 8, 128>}]} {
    %c0 = arith.constant 0 : index
    %c0_0 = arith.constant 0 : index
    %0 = vector.load %arg4[%c0, %c0_0] : memref<8x12xf32, #tpu.memory_space<vmem>>, vector<8x12xf32>
    %c0_1 = arith.constant 0 : index
    %c0_2 = arith.constant 0 : index
    %1 = vector.load %arg5[%c0_1, %c0_2] : memref<8x1xf32, #tpu.memory_space<vmem>>, vector<8x1xf32>
    %c0_3 = arith.constant 0 : index
    %c0_4 = arith.constant 0 : index
    %c0_5 = arith.constant 0 : index
    %2 = vector.load %arg2[%c0_3, %c0_4, %c0_5] : memref<2x4x128xf32, #tpu.memory_space<vmem>>, vector<1x4x128xf32>
    %3 = vector.shape_cast %2 : vector<1x4x128xf32> to vector<4x128xf32>
    %c0_6 = arith.constant 0 : index
    %c0_7 = arith.constant 0 : index
    %c0_8 = arith.constant 0 : index
    %4 = vector.load %arg3[%c0_6, %c0_7, %c0_8] : memref<2x4x128xf32, #tpu.memory_space<vmem>>, vector<1x4x128xf32>
    %5 = vector.shape_cast %4 : vector<1x4x128xf32> to vector<4x128xf32>
    %c0_i32 = arith.constant 0 : i32
    %6 = arith.cmpi sgt, %arg1, %c0_i32 : i32
    %cst = arith.constant 0.000000e+00 : f32
    %7 = vector.broadcast %cst : f32 to vector<4x128xf32>
    %8 = arith.select %6, %5, %7 : vector<4x128xf32>
    %9 = tpu.concatenate %8, %3 in 1 : vector<4x128xf32>, vector<4x128xf32> -> vector<4x256xf32>
    %cst_9 = arith.constant 0.000000e+00 : f32
    %10 = vector.broadcast %cst_9 : f32 to vector<8x128xf32>
    %11 = vector.extract_strided_slice %9 {offsets = [0, 124], sizes = [4, 128], strides = [1, 1]} : vector<4x256xf32> to vector<4x128xf32>
    %12 = vector.extract_strided_slice %0 {offsets = [0, 0], sizes = [8, 1], strides = [1, 1]} : vector<8x12xf32> to vector<8x1xf32>
    %13 = vector.extract_strided_slice %11 {offsets = [0, 0], sizes = [1, 128], strides = [1, 1]} : vector<4x128xf32> to vector<1x128xf32>
    %14 = vector.broadcast %12 : vector<8x1xf32> to vector<8x128xf32>
    %15 = vector.broadcast %13 : vector<1x128xf32> to vector<8x128xf32>
    %16 = arith.mulf %14, %15 : vector<8x128xf32>
    %17 = arith.addf %10, %16 : vector<8x128xf32>
    %18 = vector.extract_strided_slice %0 {offsets = [0, 1], sizes = [8, 1], strides = [1, 1]} : vector<8x12xf32> to vector<8x1xf32>
    %19 = vector.extract_strided_slice %11 {offsets = [1, 0], sizes = [1, 128], strides = [1, 1]} : vector<4x128xf32> to vector<1x128xf32>
    %20 = vector.broadcast %18 : vector<8x1xf32> to vector<8x128xf32>
    %21 = vector.broadcast %19 : vector<1x128xf32> to vector<8x128xf32>
    %22 = arith.mulf %20, %21 : vector<8x128xf32>
    %23 = arith.addf %17, %22 : vector<8x128xf32>
    %24 = vector.extract_strided_slice %0 {offsets = [0, 2], sizes = [8, 1], strides = [1, 1]} : vector<8x12xf32> to vector<8x1xf32>
    %25 = vector.extract_strided_slice %11 {offsets = [2, 0], sizes = [1, 128], strides = [1, 1]} : vector<4x128xf32> to vector<1x128xf32>
    %26 = vector.broadcast %24 : vector<8x1xf32> to vector<8x128xf32>
    %27 = vector.broadcast %25 : vector<1x128xf32> to vector<8x128xf32>
    %28 = arith.mulf %26, %27 : vector<8x128xf32>
    %29 = arith.addf %23, %28 : vector<8x128xf32>
    %30 = vector.extract_strided_slice %0 {offsets = [0, 3], sizes = [8, 1], strides = [1, 1]} : vector<8x12xf32> to vector<8x1xf32>
    %31 = vector.extract_strided_slice %11 {offsets = [3, 0], sizes = [1, 128], strides = [1, 1]} : vector<4x128xf32> to vector<1x128xf32>
    %32 = vector.broadcast %30 : vector<8x1xf32> to vector<8x128xf32>
    %33 = vector.broadcast %31 : vector<1x128xf32> to vector<8x128xf32>
    %34 = arith.mulf %32, %33 : vector<8x128xf32>
    %35 = arith.addf %29, %34 : vector<8x128xf32>
    %36 = vector.extract_strided_slice %9 {offsets = [0, 126], sizes = [4, 128], strides = [1, 1]} : vector<4x256xf32> to vector<4x128xf32>
    %37 = vector.extract_strided_slice %0 {offsets = [0, 4], sizes = [8, 1], strides = [1, 1]} : vector<8x12xf32> to vector<8x1xf32>
    %38 = vector.extract_strided_slice %36 {offsets = [0, 0], sizes = [1, 128], strides = [1, 1]} : vector<4x128xf32> to vector<1x128xf32>
    %39 = vector.broadcast %37 : vector<8x1xf32> to vector<8x128xf32>
    %40 = vector.broadcast %38 : vector<1x128xf32> to vector<8x128xf32>
    %41 = arith.mulf %39, %40 : vector<8x128xf32>
    %42 = arith.addf %35, %41 : vector<8x128xf32>
    %43 = vector.extract_strided_slice %0 {offsets = [0, 5], sizes = [8, 1], strides = [1, 1]} : vector<8x12xf32> to vector<8x1xf32>
    %44 = vector.extract_strided_slice %36 {offsets = [1, 0], sizes = [1, 128], strides = [1, 1]} : vector<4x128xf32> to vector<1x128xf32>
    %45 = vector.broadcast %43 : vector<8x1xf32> to vector<8x128xf32>
    %46 = vector.broadcast %44 : vector<1x128xf32> to vector<8x128xf32>
    %47 = arith.mulf %45, %46 : vector<8x128xf32>
    %48 = arith.addf %42, %47 : vector<8x128xf32>
    %49 = vector.extract_strided_slice %0 {offsets = [0, 6], sizes = [8, 1], strides = [1, 1]} : vector<8x12xf32> to vector<8x1xf32>
    %50 = vector.extract_strided_slice %36 {offsets = [2, 0], sizes = [1, 128], strides = [1, 1]} : vector<4x128xf32> to vector<1x128xf32>
    %51 = vector.broadcast %49 : vector<8x1xf32> to vector<8x128xf32>
    %52 = vector.broadcast %50 : vector<1x128xf32> to vector<8x128xf32>
    %53 = arith.mulf %51, %52 : vector<8x128xf32>
    %54 = arith.addf %48, %53 : vector<8x128xf32>
    %55 = vector.extract_strided_slice %0 {offsets = [0, 7], sizes = [8, 1], strides = [1, 1]} : vector<8x12xf32> to vector<8x1xf32>
    %56 = vector.extract_strided_slice %36 {offsets = [3, 0], sizes = [1, 128], strides = [1, 1]} : vector<4x128xf32> to vector<1x128xf32>
    %57 = vector.broadcast %55 : vector<8x1xf32> to vector<8x128xf32>
    %58 = vector.broadcast %56 : vector<1x128xf32> to vector<8x128xf32>
    %59 = arith.mulf %57, %58 : vector<8x128xf32>
    %60 = arith.addf %54, %59 : vector<8x128xf32>
    %61 = vector.extract_strided_slice %9 {offsets = [0, 128], sizes = [4, 128], strides = [1, 1]} : vector<4x256xf32> to vector<4x128xf32>
    %62 = vector.extract_strided_slice %0 {offsets = [0, 8], sizes = [8, 1], strides = [1, 1]} : vector<8x12xf32> to vector<8x1xf32>
    %63 = vector.extract_strided_slice %61 {offsets = [0, 0], sizes = [1, 128], strides = [1, 1]} : vector<4x128xf32> to vector<1x128xf32>
    %64 = vector.broadcast %62 : vector<8x1xf32> to vector<8x128xf32>
    %65 = vector.broadcast %63 : vector<1x128xf32> to vector<8x128xf32>
    %66 = arith.mulf %64, %65 : vector<8x128xf32>
    %67 = arith.addf %60, %66 : vector<8x128xf32>
    %68 = vector.extract_strided_slice %0 {offsets = [0, 9], sizes = [8, 1], strides = [1, 1]} : vector<8x12xf32> to vector<8x1xf32>
    %69 = vector.extract_strided_slice %61 {offsets = [1, 0], sizes = [1, 128], strides = [1, 1]} : vector<4x128xf32> to vector<1x128xf32>
    %70 = vector.broadcast %68 : vector<8x1xf32> to vector<8x128xf32>
    %71 = vector.broadcast %69 : vector<1x128xf32> to vector<8x128xf32>
    %72 = arith.mulf %70, %71 : vector<8x128xf32>
    %73 = arith.addf %67, %72 : vector<8x128xf32>
    %74 = vector.extract_strided_slice %0 {offsets = [0, 10], sizes = [8, 1], strides = [1, 1]} : vector<8x12xf32> to vector<8x1xf32>
    %75 = vector.extract_strided_slice %61 {offsets = [2, 0], sizes = [1, 128], strides = [1, 1]} : vector<4x128xf32> to vector<1x128xf32>
    %76 = vector.broadcast %74 : vector<8x1xf32> to vector<8x128xf32>
    %77 = vector.broadcast %75 : vector<1x128xf32> to vector<8x128xf32>
    %78 = arith.mulf %76, %77 : vector<8x128xf32>
    %79 = arith.addf %73, %78 : vector<8x128xf32>
    %80 = vector.extract_strided_slice %0 {offsets = [0, 11], sizes = [8, 1], strides = [1, 1]} : vector<8x12xf32> to vector<8x1xf32>
    %81 = vector.extract_strided_slice %61 {offsets = [3, 0], sizes = [1, 128], strides = [1, 1]} : vector<4x128xf32> to vector<1x128xf32>
    %82 = vector.broadcast %80 : vector<8x1xf32> to vector<8x128xf32>
    %83 = vector.broadcast %81 : vector<1x128xf32> to vector<8x128xf32>
    %84 = arith.mulf %82, %83 : vector<8x128xf32>
    %85 = arith.addf %79, %84 : vector<8x128xf32>
    %86 = vector.broadcast %1 : vector<8x1xf32> to vector<8x128xf32>
    %87 = arith.addf %85, %86 : vector<8x128xf32>
    %c0_10 = arith.constant 0 : index
    %c0_11 = arith.constant 0 : index
    %c0_12 = arith.constant 0 : index
    %88 = vector.load %arg6[%c0_10, %c0_11, %c0_12] : memref<2x8x128xf32, #tpu.memory_space<vmem>>, vector<1x8x128xf32>
    %89 = vector.shape_cast %88 : vector<1x8x128xf32> to vector<8x128xf32>
    %90 = vector.shape_cast %87 : vector<8x128xf32> to vector<1x8x128xf32>
    tpu.vector_store %arg6[%c0_10, %c0_11, %c0_12], %90 {strides = array<i32>} : memref<2x8x128xf32, #tpu.memory_space<vmem>>, vector<1x8x128xf32>,
    %c1 = arith.constant 1 : index
    %c0_13 = arith.constant 0 : index
    %c0_14 = arith.constant 0 : index
    %91 = vector.load %arg2[%c1, %c0_13, %c0_14] : memref<2x4x128xf32, #tpu.memory_space<vmem>>, vector<1x4x128xf32>
    %92 = vector.shape_cast %91 : vector<1x4x128xf32> to vector<4x128xf32>
    %c1_15 = arith.constant 1 : index
    %c0_16 = arith.constant 0 : index
    %c0_17 = arith.constant 0 : index
    %93 = vector.load %arg3[%c1_15, %c0_16, %c0_17] : memref<2x4x128xf32, #tpu.memory_space<vmem>>, vector<1x4x128xf32>
    %94 = vector.shape_cast %93 : vector<1x4x128xf32> to vector<4x128xf32>
    %c0_i32_18 = arith.constant 0 : i32
    %95 = arith.cmpi sgt, %arg1, %c0_i32_18 : i32
    %cst_19 = arith.constant 0.000000e+00 : f32
    %96 = vector.broadcast %cst_19 : f32 to vector<4x128xf32>
    %97 = arith.select %95, %94, %96 : vector<4x128xf32>
    %98 = tpu.concatenate %97, %92 in 1 : vector<4x128xf32>, vector<4x128xf32> -> vector<4x256xf32>
    %cst_20 = arith.constant 0.000000e+00 : f32
    %99 = vector.broadcast %cst_20 : f32 to vector<8x128xf32>
    %100 = vector.extract_strided_slice %98 {offsets = [0, 124], sizes = [4, 128], strides = [1, 1]} : vector<4x256xf32> to vector<4x128xf32>
    %101 = vector.extract_strided_slice %0 {offsets = [0, 0], sizes = [8, 1], strides = [1, 1]} : vector<8x12xf32> to vector<8x1xf32>
    %102 = vector.extract_strided_slice %100 {offsets = [0, 0], sizes = [1, 128], strides = [1, 1]} : vector<4x128xf32> to vector<1x128xf32>
    %103 = vector.broadcast %101 : vector<8x1xf32> to vector<8x128xf32>
    %104 = vector.broadcast %102 : vector<1x128xf32> to vector<8x128xf32>
    %105 = arith.mulf %103, %104 : vector<8x128xf32>
    %106 = arith.addf %99, %105 : vector<8x128xf32>
    %107 = vector.extract_strided_slice %0 {offsets = [0, 1], sizes = [8, 1], strides = [1, 1]} : vector<8x12xf32> to vector<8x1xf32>
    %108 = vector.extract_strided_slice %100 {offsets = [1, 0], sizes = [1, 128], strides = [1, 1]} : vector<4x128xf32> to vector<1x128xf32>
    %109 = vector.broadcast %107 : vector<8x1xf32> to vector<8x128xf32>
    %110 = vector.broadcast %108 : vector<1x128xf32> to vector<8x128xf32>
    %111 = arith.mulf %109, %110 : vector<8x128xf32>
    %112 = arith.addf %106, %111 : vector<8x128xf32>
    %113 = vector.extract_strided_slice %0 {offsets = [0, 2], sizes = [8, 1], strides = [1, 1]} : vector<8x12xf32> to vector<8x1xf32>
    %114 = vector.extract_strided_slice %100 {offsets = [2, 0], sizes = [1, 128], strides = [1, 1]} : vector<4x128xf32> to vector<1x128xf32>
    %115 = vector.broadcast %113 : vector<8x1xf32> to vector<8x128xf32>
    %116 = vector.broadcast %114 : vector<1x128xf32> to vector<8x128xf32>
    %117 = arith.mulf %115, %116 : vector<8x128xf32>
    %118 = arith.addf %112, %117 : vector<8x128xf32>
    %119 = vector.extract_strided_slice %0 {offsets = [0, 3], sizes = [8, 1], strides = [1, 1]} : vector<8x12xf32> to vector<8x1xf32>
    %120 = vector.extract_strided_slice %100 {offsets = [3, 0], sizes = [1, 128], strides = [1, 1]} : vector<4x128xf32> to vector<1x128xf32>
    %121 = vector.broadcast %119 : vector<8x1xf32> to vector<8x128xf32>
    %122 = vector.broadcast %120 : vector<1x128xf32> to vector<8x128xf32>
    %123 = arith.mulf %121, %122 : vector<8x128xf32>
    %124 = arith.addf %118, %123 : vector<8x128xf32>
    %125 = vector.extract_strided_slice %98 {offsets = [0, 126], sizes = [4, 128], strides = [1, 1]} : vector<4x256xf32> to vector<4x128xf32>
    %126 = vector.extract_strided_slice %0 {offsets = [0, 4], sizes = [8, 1], strides = [1, 1]} : vector<8x12xf32> to vector<8x1xf32>
    %127 = vector.extract_strided_slice %125 {offsets = [0, 0], sizes = [1, 128], strides = [1, 1]} : vector<4x128xf32> to vector<1x128xf32>
    %128 = vector.broadcast %126 : vector<8x1xf32> to vector<8x128xf32>
    %129 = vector.broadcast %127 : vector<1x128xf32> to vector<8x128xf32>
    %130 = arith.mulf %128, %129 : vector<8x128xf32>
    %131 = arith.addf %124, %130 : vector<8x128xf32>
    %132 = vector.extract_strided_slice %0 {offsets = [0, 5], sizes = [8, 1], strides = [1, 1]} : vector<8x12xf32> to vector<8x1xf32>
    %133 = vector.extract_strided_slice %125 {offsets = [1, 0], sizes = [1, 128], strides = [1, 1]} : vector<4x128xf32> to vector<1x128xf32>
    %134 = vector.broadcast %132 : vector<8x1xf32> to vector<8x128xf32>
    %135 = vector.broadcast %133 : vector<1x128xf32> to vector<8x128xf32>
    %136 = arith.mulf %134, %135 : vector<8x128xf32>
    %137 = arith.addf %131, %136 : vector<8x128xf32>
    %138 = vector.extract_strided_slice %0 {offsets = [0, 6], sizes = [8, 1], strides = [1, 1]} : vector<8x12xf32> to vector<8x1xf32>
    %139 = vector.extract_strided_slice %125 {offsets = [2, 0], sizes = [1, 128], strides = [1, 1]} : vector<4x128xf32> to vector<1x128xf32>
    %140 = vector.broadcast %138 : vector<8x1xf32> to vector<8x128xf32>
    %141 = vector.broadcast %139 : vector<1x128xf32> to vector<8x128xf32>
    %142 = arith.mulf %140, %141 : vector<8x128xf32>
    %143 = arith.addf %137, %142 : vector<8x128xf32>
    %144 = vector.extract_strided_slice %0 {offsets = [0, 7], sizes = [8, 1], strides = [1, 1]} : vector<8x12xf32> to vector<8x1xf32>
    %145 = vector.extract_strided_slice %125 {offsets = [3, 0], sizes = [1, 128], strides = [1, 1]} : vector<4x128xf32> to vector<1x128xf32>
    %146 = vector.broadcast %144 : vector<8x1xf32> to vector<8x128xf32>
    %147 = vector.broadcast %145 : vector<1x128xf32> to vector<8x128xf32>
    %148 = arith.mulf %146, %147 : vector<8x128xf32>
    %149 = arith.addf %143, %148 : vector<8x128xf32>
    %150 = vector.extract_strided_slice %98 {offsets = [0, 128], sizes = [4, 128], strides = [1, 1]} : vector<4x256xf32> to vector<4x128xf32>
    %151 = vector.extract_strided_slice %0 {offsets = [0, 8], sizes = [8, 1], strides = [1, 1]} : vector<8x12xf32> to vector<8x1xf32>
    %152 = vector.extract_strided_slice %150 {offsets = [0, 0], sizes = [1, 128], strides = [1, 1]} : vector<4x128xf32> to vector<1x128xf32>
    %153 = vector.broadcast %151 : vector<8x1xf32> to vector<8x128xf32>
    %154 = vector.broadcast %152 : vector<1x128xf32> to vector<8x128xf32>
    %155 = arith.mulf %153, %154 : vector<8x128xf32>
    %156 = arith.addf %149, %155 : vector<8x128xf32>
    %157 = vector.extract_strided_slice %0 {offsets = [0, 9], sizes = [8, 1], strides = [1, 1]} : vector<8x12xf32> to vector<8x1xf32>
    %158 = vector.extract_strided_slice %150 {offsets = [1, 0], sizes = [1, 128], strides = [1, 1]} : vector<4x128xf32> to vector<1x128xf32>
    %159 = vector.broadcast %157 : vector<8x1xf32> to vector<8x128xf32>
    %160 = vector.broadcast %158 : vector<1x128xf32> to vector<8x128xf32>
    %161 = arith.mulf %159, %160 : vector<8x128xf32>
    %162 = arith.addf %156, %161 : vector<8x128xf32>
    %163 = vector.extract_strided_slice %0 {offsets = [0, 10], sizes = [8, 1], strides = [1, 1]} : vector<8x12xf32> to vector<8x1xf32>
    %164 = vector.extract_strided_slice %150 {offsets = [2, 0], sizes = [1, 128], strides = [1, 1]} : vector<4x128xf32> to vector<1x128xf32>
    %165 = vector.broadcast %163 : vector<8x1xf32> to vector<8x128xf32>
    %166 = vector.broadcast %164 : vector<1x128xf32> to vector<8x128xf32>
    %167 = arith.mulf %165, %166 : vector<8x128xf32>
    %168 = arith.addf %162, %167 : vector<8x128xf32>
    %169 = vector.extract_strided_slice %0 {offsets = [0, 11], sizes = [8, 1], strides = [1, 1]} : vector<8x12xf32> to vector<8x1xf32>
    %170 = vector.extract_strided_slice %150 {offsets = [3, 0], sizes = [1, 128], strides = [1, 1]} : vector<4x128xf32> to vector<1x128xf32>
    %171 = vector.broadcast %169 : vector<8x1xf32> to vector<8x128xf32>
    %172 = vector.broadcast %170 : vector<1x128xf32> to vector<8x128xf32>
    %173 = arith.mulf %171, %172 : vector<8x128xf32>
    %174 = arith.addf %168, %173 : vector<8x128xf32>
    %175 = vector.broadcast %1 : vector<8x1xf32> to vector<8x128xf32>
    %176 = arith.addf %174, %175 : vector<8x128xf32>
    %c1_21 = arith.constant 1 : index
    %c0_22 = arith.constant 0 : index
    %c0_23 = arith.constant 0 : index
    %177 = vector.load %arg6[%c1_21, %c0_22, %c0_23] : memref<2x8x128xf32, #tpu.memory_space<vmem>>, vector<1x8x128xf32>
    %178 = vector.shape_cast %177 : vector<1x8x128xf32> to vector<8x128xf32>
    %179 = vector.shape_cast %176 : vector<8x128xf32> to vector<1x8x128xf32>
    tpu.vector_store %arg6[%c1_21, %c0_22, %c0_23], %179 {strides = array<i32>} : memref<2x8x128xf32, #tpu.memory_space<vmem>>, vector<1x8x128xf32>,
    return
  }
  func.func @transform_0(%arg0: i32, %arg1: i32) -> (i32, i32, i32) {
    %c0_i32 = arith.constant 0 : i32
    %c0_i32_0 = arith.constant 0 : i32
    return %arg0, %c0_i32, %arg1 : i32, i32, i32
  }
  func.func @transform_1(%arg0: i32, %arg1: i32) -> (i32, i32, i32) {
    %c1_i32 = arith.constant 1 : i32
    %0 = arith.muli %arg1, %c1_i32 : i32
    %c1_i32_0 = arith.constant 1 : i32
    %1 = arith.subi %0, %c1_i32_0 : i32
    %c0_i32 = arith.constant 0 : i32
    %2 = arith.maxsi %1, %c0_i32 : i32
    %c0_i32_1 = arith.constant 0 : i32
    %c0_i32_2 = arith.constant 0 : i32
    return %arg0, %c0_i32_1, %2 : i32, i32, i32
  }
  func.func @transform_2(%arg0: i32, %arg1: i32) -> (i32, i32) {
    %c0_i32 = arith.constant 0 : i32
    %c0_i32_0 = arith.constant 0 : i32
    %c0_i32_1 = arith.constant 0 : i32
    return %c0_i32, %c0_i32_0 : i32, i32
  }
  func.func @transform_3(%arg0: i32, %arg1: i32) -> (i32, i32) {
    %c0_i32 = arith.constant 0 : i32
    %c0_i32_0 = arith.constant 0 : i32
    %c0_i32_1 = arith.constant 0 : i32
    return %c0_i32, %c0_i32_0 : i32, i32
  }
  func.func @transform_4(%arg0: i32, %arg1: i32) -> (i32, i32, i32) {
    %c0_i32 = arith.constant 0 : i32
    %c0_i32_0 = arith.constant 0 : i32
    return %arg0, %c0_i32, %arg1 : i32, i32, i32
  }
}

</mosaic_0001>

<bundles_post_ra>
// kernel: tpu_custom_call.1
= control target key start
LH: loop header
LB: loop body
LE: loop exit
PB: predicated region body
PF: predicated region fallthrough
CT: control target
= control target key end

     0   :  { %9 = vsyncpa [#allocation3], 0  ;;  %s621_s0 = inlined_call_operand.vmem [shape: f32[2,4,128], index: 0, kind: input, shape index: {}]   ;;  %s622_s1 = inlined_call_operand.hbm [shape: f32[2,4,128], index: 1, kind: input, shape index: {}]   ;;  %s623_s2 = inlined_call_operand.vmem [shape: f32[8,12], index: 2, kind: input, shape index: {}]   ;;  %s624_s3 = inlined_call_operand.vmem [shape: f32[8,1], index: 3, kind: input, shape index: {}]   ;;  %s625_s4 = inlined_call_operand.hbm [shape: f32[2,8,128], index: 4, kind: output, shape index: {}]  }
   0x1   :  { %10 = vsyncpa [#allocation4], 0  ;;  %s490_s15 = smov [#allocation2]   ;;  %s442_s19 = scalar_lea.hbm %s622_s1, 128 }
   0x2   :  { %s23_s16 = sshll.u32 %s490_s15, 4  ;;  %p443_p0 = scmp.ne.s32.totalorder %s622_s1, %s442_s19  ;;  %s24_s16 = int_to_ptr.vmem [resolvable:$true] %s23_s16 }
   0x3   :  { %p446_p1 = scmp.lt.u32.totalorder %s442_s19, %s622_s1 }
   0x5   :  { %p448_p2 = pnand %p446_p1, %p443_p0 }
   0x7   :  { %451 = shalt.err (!%p448_p2)
}
   0x8   :  { %s452_s24 = scalar_lea.vmem %s24_s16, 128  ;;  %p457_p4 = scmp.lt.s32.totalorder %s24_s16, %s24_s16 }
   0x9   :  { %p453_p3 = scmp.ne.s32.totalorder %s24_s16, %s452_s24  ;;  %p458_p5 = scmp.lt.s32.totalorder %s452_s24, %s452_s24 }
   0xb   :  { %p459_p6 = por %p458_p5, %p457_p4 }
   0xd   :  { %p460_p7 = pnand %p459_p6, %p453_p3 }
   0xf   :  { %463 = shalt.err (!%p460_p7)
}
  0x10   :  { %s491_s25 = smov 64   ;;  %s492_s26 = smov 4  }
  0x11   :  { %29 = dma.hbm_to_vmem [thread:$0]  %s622_s1, 128, %s24_s16, [#allocation3], %s491_s25, %s491_s25, %s492_s26  }
  0x12   :  { %486 = dma.done.wait [#allocation3], 128  }
  0x13   :  { %487 = vsyncadd [#allocation3], 4294967168  ;;  %v493_v0 = vmov 4   ;;  %v494_v1 = vmov 6   ;;  %v40_v2 = vld [vmem:[%s623_s2] sm:$0xff]  ;;  %v495_v3 = vmov 5   ;;  %v54_v14 = vlaneseq }
  0x14   :  { %430 = vset.pattern.permute.xlu0 %v493_v0  ;;  %432 = vset.pattern.permute.xlu1 %v494_v1  ;;  %v496_v4 = vmov 7   ;;  %v497_v5 = vmov 8   ;;  %v498_v6 = vmov 9   ;;  %v499_v7 = vmov 10   ;;  %v41_v11 = vld [vmem:[%s624_s3] sm:$0xff]  ;;  %s506_s8 = smov 126  }
  0x15   :  { %115 = vperm.xlu0 %430, %v40_v2   ;;  %150 = vperm.xlu1 %432, %v40_v2   ;;  %v500_v8 = vmov 3   ;;  %v501_v9 = vmov 11   ;;  %v502_v10 = vmov 0   ;;  %v503_v12 = vmov 1   ;;  %v42_v19 = vld [vmem:[%s621_s0] sm:$0xf] }
  0x16   :  { %v504_v13 = vmov 2   ;;  %v55_v15 = vshrl.u32 %v54_v14, 7  ;;  %v505_v17 = vmov 0.0   ;;  %v408_v24 = vld [vmem:[%s621_s0 + $0x4] sm:$0xf]  ;;  %s507_s0 = smov 124  }
  0x17   :  { %vm126_vm0 = vcmask 1031168   ;;  %vm240_vm1 = vcmask 31744   ;;  %s508_s9 = smov [#allocation5]  }
  0x18   :  { %v56_v16 = vsub.s32 0, %v55_v15  ;;  %v72_v20 = vsub.s32 1, %v55_v15  ;;  %v88_v27 = vsub.s32 2, %v55_v15  ;;  %v104_v40 = vsub.s32 3, %v55_v15  ;;  %s394_s10 = sshll.u32 %s508_s9, 4  ;;  %s395_s10 = int_to_ptr.vmem [resolvable:$true] %s394_s10 }
  0x19   :  { %431 = vset.pattern.permute.xlu0 %v495_v3  ;;  %433 = vset.pattern.permute.xlu1 %v496_v4  ;;  %s464_s11 = scalar_lea.vmem %s395_s10, 256  ;;  %p469_p9 = scmp.lt.s32.totalorder %s395_s10, %s395_s10 }
  0x1a   :  { %133 = vperm.xlu0 %431, %v40_v2   ;;  %167 = vperm.xlu1 %433, %v40_v2   ;;  %v57_v18 = vrot.slane %v505_v17, %v56_v16  ;;  %v61_v22 = vrot.slane %v42_v19, %v56_v16  ;;  %v73_v25 = vrot.slane %v505_v17, %v72_v20  ;;  %p465_p8 = scmp.ne.s32.totalorder %s395_s10, %s464_s11  ;;  %p470_p10 = scmp.lt.s32.totalorder %s464_s11, %s464_s11 }
  0x1b   :  { %v563_v28 = vrot.slane %v408_v24, %v56_v16  ;;  %v565_v32 = vrot.slane %v42_v19, %v72_v20  ;;  %v89_v34 = vrot.slane %v505_v17, %v88_v27  ;;  %v268_v41 = vrot.slane %v408_v24, %v72_v20 }
  0x1c   :  { %v93_v42 = vrot.slane %v42_v19, %v88_v27  ;;  %v105_v45 = vrot.slane %v505_v17, %v104_v40  ;;  %v280_v49 = vrot.slane %v408_v24, %v88_v27  ;;  %v109_v52 = vrot.slane %v42_v19, %v104_v40  ;;  %p471_p11 = por %p470_p10, %p469_p9 }
  0x1e   :  { %434 = vset.pattern.permute.xlu1 %v497_v5  ;;  %435 = vset.pattern.permute.xlu0 %v498_v6  ;;  %p472_p12 = pnand %p471_p11, %p465_p8 }
  0x1f   :  { %184 = vperm.xlu1 %434, %v40_v2   ;;  %195 = vperm.xlu0 %435, %v40_v2  }
  0x23   :  { %436 = vset.pattern.permute.xlu1 %v499_v7  ;;  %440 = vset.pattern.permute.xlu0 %v500_v8 }
  0x24   :  { %206 = vperm.xlu1 %436, %v40_v2   ;;  %99 = vperm.xlu0 %440, %v40_v2  }
  0x28   :  { %437 = vset.pattern.permute.xlu1 %v501_v9  ;;  %441 = vset.pattern.permute.xlu0 %v502_v10 }
  0x29   :  { %217 = vperm.xlu1 %437, %v40_v2   ;;  %51 = vperm.xlu0 %441, %v40_v2  }
  0x2d   :  { %438 = vset.pattern.permute.xlu1 %v503_v12  ;;  %229 = vperm.xlu0 %441, %v41_v11  }
  0x2e   :  { %67 = vperm.xlu1 %438, %v40_v2  }
  0x32   :  { %439 = vset.pattern.permute.xlu1 %v504_v13 }
  0x33   :  { %83 = vperm.xlu1 %439, %v40_v2   ;;  %v292_v2 = vrot.slane %v408_v24, %v104_v40 }
  0x94   :  { %v116_v21 = vpop.permute.xlu0 %115  ;;  %v151_v26 = vpop.permute.xlu1 %150 }
  0x95   :  { %v118_v23 = vmul.f32 %v116_v21, %v57_v18  ;;  %v119_v29 = vmul.f32 %v116_v21, %v61_v22  ;;  %v298_v35 = vmul.f32 %v563_v28, %v116_v21  ;;  %v153_v39 = vmul.f32 %v151_v26, %v89_v34 }
  0x96   :  { %v154_v47 = vmul.f32 %v151_v26, %v93_v42  ;;  %v324_v56 = vmul.f32 %v280_v49, %v151_v26 }
  0x97   :  { %301 = vrot.lane.b32.xlu0 %v118_v23, %s506_s8  ;;  %122 = vrot.lane.b32.xlu1 %v118_v23, %s506_s8 }
  0x99   :  { %v134_v30 = vpop.permute.xlu0 %133  ;;  %v168_v33 = vpop.permute.xlu1 %167 }
  0x9a   :  { %v136_v31 = vmul.f32 %v134_v30, %v73_v25  ;;  %v137_v36 = vmul.f32 %v134_v30, %v565_v32  ;;  %v311_v46 = vmul.f32 %v268_v41, %v134_v30  ;;  %v170_v48 = vmul.f32 %v168_v33, %v105_v45 }
  0x9b   :  { %124 = vrot.lane.b32.xlu1 %v119_v29, %s506_s8  ;;  %v171_v61 = vmul.f32 %v168_v33, %v109_v52  ;;  %v337_v11 = vmul.f32 %v292_v2, %v168_v33 }
  0x9c   :  { %140 = vrot.lane.b32.xlu0 %v136_v31, %s506_s8 }
  0x9e   :  { %v185_v37 = vpop.permute.xlu1 %184  ;;  %v572_v38 = vpop.permute.xlu0 %195 }
  0x9f   :  { %303 = vrot.lane.b32.xlu1 %v298_v35, %s506_s8  ;;  %v187_v62 = vmul.f32 %v185_v37, %v61_v22  ;;  %v349_v15 = vmul.f32 %v563_v28, %v185_v37  ;;  %v198_v20 = vmul.f32 %v572_v38, %v565_v32  ;;  %v356_v21 = vmul.f32 %v268_v41, %v572_v38 }
  0xa0   :  { %314 = vrot.lane.b32.xlu0 %v136_v31, %s506_s8 }
  0xa3   :  { %142 = vrot.lane.b32.xlu1 %v137_v36, %s506_s8  ;;  %v207_v43 = vpop.permute.xlu1 %206  ;;  %v100_v44 = vpop.permute.xlu0 %99 }
  0xa4   :  { %157 = vrot.lane.b32.xlu0 %v153_v39, %s506_s8  ;;  %v110_v3 = vmul.f32 %v105_v45, %v100_v44  ;;  %v111_v4 = vmul.f32 %v109_v52, %v100_v44  ;;  %v294_v6 = vmul.f32 %v292_v2, %v100_v44  ;;  %v209_v10 = vmul.f32 %v207_v43, %v93_v42 }
  0xa7   :  { %316 = vrot.lane.b32.xlu1 %v311_v46, %s506_s8 }
  0xa8   :  { %327 = vrot.lane.b32.xlu0 %v153_v39, %s506_s8  ;;  %v218_v50 = vpop.permute.xlu1 %217  ;;  %v52_v51 = vpop.permute.xlu0 %51 }
  0xa9   :  { %v62_v53 = vmul.f32 %v57_v18, %v52_v51  ;;  %v63_v54 = vmul.f32 %v61_v22, %v52_v51  ;;  %v258_v55 = vmul.f32 %v563_v28, %v52_v51  ;;  %v220_v19 = vmul.f32 %v218_v50, %v109_v52 }
  0xaa   :  { %v363_v22 = vmul.f32 %v280_v49, %v207_v43  ;;  %v370_v23 = vmul.f32 %v292_v2, %v218_v50 }
  0xab   :  { %159 = vrot.lane.b32.xlu1 %v154_v47, %s506_s8 }
  0xac   :  { %174 = vrot.lane.b32.xlu0 %v170_v48, %s506_s8  ;;  %v591_v24 = vpop.permute.xlu0 %229 }
  0xad   :  { %v68_v57 = vpop.permute.xlu1 %67 }
  0xae   :  { %v78_v58 = vmul.f32 %v73_v25, %v68_v57  ;;  %v79_v59 = vmul.f32 %v565_v32, %v68_v57  ;;  %v270_v60 = vmul.f32 %v268_v41, %v68_v57 }
  0xaf   :  { %329 = vrot.lane.b32.xlu1 %v324_v56, %s506_s8 }
  0xb0   :  { %340 = vrot.lane.b32.xlu0 %v170_v48, %s506_s8  ;;  %v80_v63 = vadd.f32 %v78_v58, %v62_v53  ;;  %v81_v0 = vadd.f32 %v79_v59, %v63_v54  ;;  %v272_v1 = vadd.f32 %v270_v60, %v258_v55 }
  0xb2   :  { %v84_v5 = vpop.permute.xlu1 %83 }
  0xb3   :  { %176 = vrot.lane.b32.xlu1 %v171_v61, %s506_s8  ;;  %v94_v7 = vmul.f32 %v89_v34, %v84_v5  ;;  %v95_v8 = vmul.f32 %v93_v42, %v84_v5  ;;  %v282_v9 = vmul.f32 %v280_v49, %v84_v5 }
  0xb4   :  { %189 = vrot.lane.b32.xlu0 %v187_v62, %s507_s0 }
  0xb5   :  { %v96_v12 = vadd.f32 %v94_v7, %v80_v63  ;;  %v97_v13 = vadd.f32 %v95_v8, %v81_v0  ;;  %v284_v14 = vadd.f32 %v282_v9, %v272_v1 }
  0xb7   :  { %342 = vrot.lane.b32.xlu1 %v337_v11, %s506_s8  ;;  %v112_v16 = vadd.f32 %v110_v3, %v96_v12  ;;  %v113_v17 = vadd.f32 %v111_v4, %v97_v13  ;;  %v296_v18 = vadd.f32 %v294_v6, %v284_v14 }
  0xb8   :  { %211 = vrot.lane.b32.xlu0 %v209_v10, %s507_s0 }
  0xbb   :  { %351 = vrot.lane.b32.xlu1 %v349_v15, %s507_s0 }
  0xbc   :  { %222 = vrot.lane.b32.xlu0 %v220_v19, %s507_s0 }
  0xbf   :  { %200 = vrot.lane.b32.xlu1 %v198_v20, %s507_s0 }
  0xc3   :  { %358 = vrot.lane.b32.xlu1 %v356_v21, %s507_s0 }
  0xc7   :  { %365 = vrot.lane.b32.xlu1 %v363_v22, %s507_s0 }
  0xcb   :  { %372 = vrot.lane.b32.xlu1 %v370_v23, %s507_s0 }
 0x109   :  { %v123_v25 = vpop.permute.xlu1 %122  ;;  %v302_v26 = vpop.permute.xlu0 %301 }
 0x10d   :  { %v125_v27 = vpop.permute.xlu1 %124 }
 0x10e   :  { %v141_v28 = vpop.permute.xlu0 %140  ;;  %v127_v38 = vsel %vm126_vm0, %v123_v25, %v125_v27  ;;  %v131_v43 = vadd.f32 %v125_v27, %v113_v17 }
 0x10f   :  { %v130_v42 = vadd.f32 %v127_v38, %v112_v16 }
 0x111   :  { %v304_v29 = vpop.permute.xlu1 %303 }
 0x112   :  { %v315_v30 = vpop.permute.xlu0 %314  ;;  %v305_v52 = vsel %vm126_vm0, %v302_v26, %v304_v29  ;;  %v309_v60 = vadd.f32 %v304_v29, %v296_v18 }
 0x113   :  { %v308_v58 = vadd.f32 %v305_v52, %v112_v16 }
 0x115   :  { %v143_v31 = vpop.permute.xlu1 %142 }
 0x116   :  { %v158_v33 = vpop.permute.xlu0 %157  ;;  %v144_v40 = vsel %vm126_vm0, %v141_v28, %v143_v31  ;;  %v148_v46 = vadd.f32 %v143_v31, %v131_v43 }
 0x117   :  { %v147_v45 = vadd.f32 %v144_v40, %v130_v42 }
 0x119   :  { %v317_v32 = vpop.permute.xlu1 %316 }
 0x11a   :  { %v328_v34 = vpop.permute.xlu0 %327  ;;  %v318_v55 = vsel %vm126_vm0, %v315_v30, %v317_v32  ;;  %v322_v2 = vadd.f32 %v317_v32, %v309_v60 }
 0x11b   :  { %v321_v61 = vadd.f32 %v318_v55, %v308_v58 }
 0x11d   :  { %v160_v35 = vpop.permute.xlu1 %159 }
 0x11e   :  { %v175_v36 = vpop.permute.xlu0 %174  ;;  %v161_v44 = vsel %vm126_vm0, %v158_v33, %v160_v35  ;;  %v165_v51 = vadd.f32 %v160_v35, %v148_v46 }
 0x11f   :  { %v164_v50 = vadd.f32 %v161_v44, %v147_v45 }
 0x121   :  { %v330_v37 = vpop.permute.xlu1 %329 }
 0x122   :  { %v341_v39 = vpop.permute.xlu0 %340  ;;  %v331_v59 = vsel %vm126_vm0, %v328_v34, %v330_v37  ;;  %v335_v7 = vadd.f32 %v330_v37, %v322_v2 }
 0x123   :  { %v334_v3 = vadd.f32 %v331_v59, %v321_v61 }
 0x125   :  { %v177_v41 = vpop.permute.xlu1 %176 }
 0x126   :  { %v178_v47 = vsel %vm126_vm0, %v175_v36, %v177_v41  ;;  %v190_v48 = vpop.permute.xlu0 %189  ;;  %v182_v54 = vadd.f32 %v177_v41, %v165_v51 }
 0x127   :  { %v181_v53 = vadd.f32 %v178_v47, %v164_v50 }
 0x128   :  { %v193_v63 = vadd.f32 %v190_v48, %v182_v54 }
 0x129   :  { %v343_v49 = vpop.permute.xlu1 %342  ;;  %v192_v62 = vadd.f32 %v190_v48, %v181_v53 }
 0x12a   :  { %v212_v57 = vpop.permute.xlu0 %211  ;;  %v344_v0 = vsel %vm126_vm0, %v341_v39, %v343_v49  ;;  %v348_v12 = vadd.f32 %v343_v49, %v335_v7 }
 0x12b   :  { %v347_v8 = vadd.f32 %v344_v0, %v334_v3 }
 0x12d   :  { %v352_v56 = vpop.permute.xlu1 %351 }
 0x12e   :  { %v223_v6 = vpop.permute.xlu0 %222  ;;  %v354_v15 = vadd.f32 %v352_v56, %v347_v8  ;;  %v355_v16 = vadd.f32 %v352_v56, %v348_v12 }
 0x131   :  { %v201_v1 = vpop.permute.xlu1 %200 }
 0x132   :  { %v203_v4 = vadd.f32 %v201_v1, %v192_v62  ;;  %v204_v5 = vadd.f32 %v201_v1, %v193_v63 }
 0x134   :  { %v214_v9 = vadd.f32 %v212_v57, %v203_v4  ;;  %v215_v10 = vadd.f32 %v212_v57, %v204_v5 }
 0x135   :  { %v359_v11 = vpop.permute.xlu1 %358 }
 0x136   :  { %v225_v13 = vadd.f32 %v223_v6, %v214_v9  ;;  %v226_v14 = vadd.f32 %v223_v6, %v215_v10  ;;  %v361_v20 = vadd.f32 %v359_v11, %v354_v15  ;;  %v362_v21 = vadd.f32 %v359_v11, %v355_v16 }
 0x138   :  { %v233_v17 = vadd.f32 %v591_v24, %v226_v14  ;;  %v232_v18 = vadd.f32 %v591_v24, %v225_v13 }
 0x139   :  { %v366_v19 = vpop.permute.xlu1 %365 }
 0x13a   :  { %238 = vrot.lane.b32.xlu1 %v233_v17, %s492_s26  ;;  %236 = vrot.lane.b32.xlu0 %v232_v18, %s492_s26  ;;  %v368_v22 = vadd.f32 %v366_v19, %v361_v20  ;;  %v369_v23 = vadd.f32 %v366_v19, %v362_v21 }
 0x13d   :  { %v373_v25 = vpop.permute.xlu1 %372 }
 0x13e   :  { %v375_v26 = vadd.f32 %v373_v25, %v368_v22  ;;  %v376_v27 = vadd.f32 %v373_v25, %v369_v23 }
 0x140   :  { %v378_v28 = vadd.f32 %v376_v27, %v591_v24  ;;  %v377_v29 = vadd.f32 %v375_v26, %v591_v24 }
 0x142   :  { %383 = vrot.lane.b32.xlu1 %v378_v28, %s492_s26  ;;  %381 = vrot.lane.b32.xlu0 %v377_v29, %s492_s26 }
 0x1ac   :  { %v239_v30 = vpop.permute.xlu1 %238  ;;  %v237_v31 = vpop.permute.xlu0 %236 }
 0x1ad   :  { %v241_v33 = vsel %vm240_vm1, %v237_v31, %v239_v30 }
 0x1ae   :  { %243 = vst [vmem:[#allocation5] sm:$0xff] %v241_v33 }
 0x1b4   :  { %v384_v32 = vpop.permute.xlu1 %383  ;;  %v382_v34 = vpop.permute.xlu0 %381 }
 0x1b5   :  { %v385_v35 = vsel %vm240_vm1, %v382_v34, %v384_v32 }
 0x1b6   :  { %388 = vst [vmem:[#allocation5 + $0x8] sm:$0xff] %v385_v35 }
 0x1b7   :  { %475 = shalt.err (!%p472_p12)
}
 0x1b8   :  { %s476_s14 = scalar_lea.hbm %s625_s4, 256 }
 0x1b9   :  { %p477_p13 = scmp.ne.s32.totalorder %s625_s4, %s476_s14  ;;  %p480_p0 = scmp.lt.u32.totalorder %s476_s14, %s625_s4 }
 0x1bb   :  { %p482_p1 = pnand %p480_p0, %p477_p13 }
 0x1bd   :  { %485 = shalt.err (!%p482_p1)
}
 0x1be   :  { %s509_s19 = smov 128   ;;  %s510_s20 = smov 8  }
 0x1bf   :  { %400 = dma.vmem_to_hbm [thread:$0]  %s395_s10, 256, %s625_s4, [#allocation4], %s509_s19, %s509_s19, %s510_s20  }
 0x1c0   :  { %488 = dma.done.wait [#allocation4], 256  }
 0x1c1   :  { %489 = vsyncadd [#allocation4], 4294967040 }
 0x1c2   :  { %404 = vsyncpa [#allocation3], 1 }
 0x1c3   :  { %405 = vsyncpa [#allocation4], 1 }

</bundles_post_ra>
